<compile_context>
chip_gen: v5e
topology: v5e:2x2
jax: 0.10.0
libtpu: 0.0.40
codegen_flags: <defaults>
</compile_context>

<pallas_src>
import jax
import jax.numpy as jnp
from jax.experimental import pallas as pl
from jax.experimental.pallas import tpu as pltpu


def _round_up(x, m):
    return (x + m - 1) // m * m


def _attentional_classify_kernel(sim_ref, y_ref, out_ref):
    # sim_ref: (S, TB)  similarities, batch rows on lanes
    # y_ref:   (S, C, TB) one-hot support labels, batch rows on lanes
    # out_ref: (C, TB)  softmax(sim) @ y, batch rows on lanes
    sim = sim_ref[...].astype(jnp.float32)                     # (S, TB)

    # Numerically stable softmax over the support-set axis.  S sits on the
    # sublane axis, so the max/sum are cheap sublane reduces (XLU) and the
    # exp (EUP) / subtract / divide run with all 128 lanes busy.
    m = jnp.max(sim, axis=0, keepdims=True)                    # (1, TB)
    e = jnp.exp(sim - m)                                       # (S, TB)
    denom = jnp.sum(e, axis=0, keepdims=True)                  # (1, TB)
    probs = e / denom                                          # exact f32

    # preds[c, b] = sum_s probs[s, b] * y[s, c, b]
    # Per-row (1,S)@(S,C) matvecs would use <2% of the MXU, so keep this on
    # the VPU: broadcast-multiply + reduce over the leading S axis.  With the
    # batch on lanes this is fully lane-dense.
    y = y_ref[...].astype(jnp.float32)                         # (S, C, TB)
    preds = jnp.sum(probs[:, None, :] * y, axis=0)             # (C, TB)

    out_ref[...] = preds.astype(out_ref.dtype)


def attentional_classify(similarities, support_set_y, *,
                         vmem_budget_bytes=12 << 20):
    """similarities: [B, S]; support_set_y: [B, S, C] -> softmax(sim) @ y.

    Matches the PyTorch module, including torch's .squeeze() behaviour on the
    (B, 1, C) bmm result.
    """
    B, S = similarities.shape
    Bc, Sc, C = support_set_y.shape
    assert (B, S) == (Bc, Sc)

    out_dtype = jnp.promote_types(similarities.dtype, support_set_y.dtype)

    # ---- Relayout: batch -> lane axis. One XLA pass over y, tiny for sim. ----
    sim_t = similarities.T                                     # (S, B)
    y_t = jnp.transpose(support_set_y, (1, 2, 0))              # (S, C, B), native dtype

    sim_isz = jnp.dtype(sim_t.dtype).itemsize
    y_isz = jnp.dtype(y_t.dtype).itemsize
    out_isz = jnp.dtype(out_dtype).itemsize

    # ---- Padded VMEM footprint per batch lane (double-buffered blocks). ----
    # (S, TB) block   -> round_up(S,8) sublanes x TB lanes
    # (S, C, TB) block-> S x round_up(C,8) sublanes x TB lanes
    # (C, TB) block   -> round_up(C,8) sublanes x TB lanes
    s_pad = _round_up(S, 8)
    c_pad = _round_up(C, 8)
    bytes_per_lane = 2 * (s_pad * sim_isz
                          + S * c_pad * y_isz
                          + c_pad * out_isz)
    tb_vmem_cap = max(128, (vmem_budget_bytes // bytes_per_lane) // 128 * 128)

    if B <= 128:
        # Whole batch fits one vreg width of lanes: a single block whose dims
        # equal the full array dims (no alignment constraint, no padding).
        tb = B
    else:
        # Aim for >= ~8 grid steps (megacore split on v7x + pipeline overlap),
        # capped by the padded-footprint VMEM budget; tb is a lane multiple.
        tb_target = max(128, _round_up(-(-B // 8), 128))
        tb = min(tb_vmem_cap, tb_target)
    grid = pl.cdiv(B, tb)          # tail block (if any) is masked; no jnp.pad of y

    # Explicit VMEM limit from the real footprint (+ headroom); stays within
    # v7x's 64 MiB physical per-TC and below v5e's needs for small tiles.
    tile_bytes = bytes_per_lane * _round_up(tb, 128)
    vmem_limit = int(min(64 << 20, max(8 << 20, 2 * tile_bytes)))

    out_t = pl.pallas_call(
        _attentional_classify_kernel,
        out_shape=jax.ShapeDtypeStruct((C, B), out_dtype),
        grid=(grid,),
        in_specs=[
            pl.BlockSpec((S, tb), lambda i: (0, i)),
            pl.BlockSpec((S, C, tb), lambda i: (0, 0, i)),
        ],
        out_specs=pl.BlockSpec((C, tb), lambda i: (0, i)),
        compiler_params=pltpu.CompilerParams(
            dimension_semantics=("parallel",),
            vmem_limit_bytes=vmem_limit,
        ),
    )(sim_t, y_t)

    preds = out_t.T                                            # (B, C), tiny
    # torch's .squeeze() drops every size-1 dim of the (B, 1, C) bmm result.
    return jnp.squeeze(preds[:, None, :])


def _reference(similarities, support_set_y):
    # Pure-VPU f32 reference (no matmul precision involved on either side).
    p = jax.nn.softmax(similarities, axis=-1)
    out = jnp.sum(p[:, :, None] * support_set_y, axis=1)
    return jnp.squeeze(out[:, None, :])


if __name__ == "__main__":
    key = jax.random.PRNGKey(0)
    k1, k2 = jax.random.split(key)

    B, S, C = 2, 8, 5  # batch, support-set length, classes_num

    similarities = jax.random.normal(k1, (B, S), dtype=jnp.float32)

    # support_set_y: one-hot class labels of the support set, [B, S, C]
    labels = jax.random.randint(k2, (B, S), 0, C)
    support_set_y = jax.nn.one_hot(labels, C, dtype=jnp.float32)

    preds = attentional_classify(similarities, support_set_y)
    preds = jax.block_until_ready(preds)

    ref = _reference(similarities, support_set_y)
    assert preds.shape == (B, C), preds.shape
    assert jnp.allclose(preds, ref, atol=1e-5, rtol=1e-5), "mismatch vs reference"

    print("KERNEL_OK")
</pallas_src>

<mosaic_0001>
module attributes {stable_mosaic.version = 11 : i64} {
  func.func @_attentional_classify_kernel(%arg0: i32, %arg1: memref<8x2xf32, #tpu.memory_space<vmem>>, %arg2: memref<8x5x2xf32, #tpu.memory_space<vmem>>, %arg3: memref<5x2xf32, #tpu.memory_space<vmem>>) attributes {dimension_semantics = [#tpu.dimension_semantics<parallel>], iteration_bounds = array<i64: 1>, scalar_prefetch = 0 : i64, scratch_operands = 0 : i64, tpu.core_type = #tpu.core_type<tc>, window_params = [{transform_indices = @transform_0, window_bounds = array<i64: 8, 2>}, {transform_indices = @transform_1, window_bounds = array<i64: 8, 5, 2>}, {transform_indices = @transform_2, window_bounds = array<i64: 5, 2>}]} {
    %c0 = arith.constant 0 : index
    %c0_0 = arith.constant 0 : index
    %0 = vector.load %arg1[%c0, %c0_0] : memref<8x2xf32, #tpu.memory_space<vmem>>, vector<8x2xf32>
    %cst = arith.constant dense<0xFF800000> : vector<2xf32>
    %1 = vector.multi_reduction <maximumf>, %0, %cst [0] : vector<8x2xf32> to vector<2xf32>
    %2 = vector.shape_cast %1 : vector<2xf32> to vector<1x2xf32>
    %3 = vector.broadcast %2 : vector<1x2xf32> to vector<8x2xf32>
    %4 = arith.subf %0, %3 : vector<8x2xf32>
    %5 = math.exp %4 : vector<8x2xf32>
    %cst_1 = arith.constant dense<0.000000e+00> : vector<2xf32>
    %6 = vector.multi_reduction <add>, %5, %cst_1 [0] : vector<8x2xf32> to vector<2xf32>
    %7 = vector.shape_cast %6 : vector<2xf32> to vector<1x2xf32>
    %8 = vector.broadcast %7 : vector<1x2xf32> to vector<8x2xf32>
    %9 = arith.divf %5, %8 : vector<8x2xf32>
    %c0_2 = arith.constant 0 : index
    %c0_3 = arith.constant 0 : index
    %c0_4 = arith.constant 0 : index
    %10 = vector.load %arg2[%c0_2, %c0_3, %c0_4] : memref<8x5x2xf32, #tpu.memory_space<vmem>>, vector<8x5x2xf32>
    %11 = vector.shape_cast %9 : vector<8x2xf32> to vector<8x1x2xf32>
    %12 = vector.broadcast %11 : vector<8x1x2xf32> to vector<8x5x2xf32>
    %13 = arith.mulf %12, %10 : vector<8x5x2xf32>
    %cst_5 = arith.constant dense<0.000000e+00> : vector<5x2xf32>
    %14 = vector.multi_reduction <add>, %13, %cst_5 [0] : vector<8x5x2xf32> to vector<5x2xf32>
    %c0_6 = arith.constant 0 : index
    %c0_7 = arith.constant 0 : index
    %15 = vector.load %arg3[%c0_6, %c0_7] : memref<5x2xf32, #tpu.memory_space<vmem>>, vector<5x2xf32>
    tpu.vector_store %arg3[%c0_6, %c0_7], %14 {strides = array<i32>} : memref<5x2xf32, #tpu.memory_space<vmem>>, vector<5x2xf32>,
    return
  }
  func.func @transform_0(%arg0: i32) -> (i32, i32) {
    %c0_i32 = arith.constant 0 : i32
    %c0_i32_0 = arith.constant 0 : i32
    return %c0_i32, %arg0 : i32, i32
  }
  func.func @transform_1(%arg0: i32) -> (i32, i32, i32) {
    %c0_i32 = arith.constant 0 : i32
    %c0_i32_0 = arith.constant 0 : i32
    %c0_i32_1 = arith.constant 0 : i32
    return %c0_i32, %c0_i32_0, %arg0 : i32, i32, i32
  }
  func.func @transform_2(%arg0: i32) -> (i32, i32) {
    %c0_i32 = arith.constant 0 : i32
    %c0_i32_0 = arith.constant 0 : i32
    return %c0_i32, %arg0 : i32, i32
  }
}

</mosaic_0001>

<bundles_post_ra>
// kernel: tpu_custom_call.1
= control target key start
LH: loop header
LB: loop body
LE: loop exit
PB: predicated region body
PF: predicated region fallthrough
CT: control target
= control target key end

     0   :  { %vm12_vm0 = vcmask 15360   ;;  %vm85_vm5 = vcmask 12288   ;;  %s164_s0 = inlined_call_operand.vmem [shape: f32[8,2], index: 0, kind: input, shape index: {}]   ;;  %s165_s1 = inlined_call_operand.vmem [shape: f32[8,5,2], index: 1, kind: input, shape index: {}]   ;;  %s166_s2 = inlined_call_operand.vmem [shape: f32[5,2], index: 2, kind: output, shape index: {}]  }
   0x1   :  { %v11_v0 = vld [vmem:[%s164_s0] sm:$0xff]  ;;  %v46_v30 = vld [vmem:[%s165_s1 + $0x8] sm:$0x1f]  ;;  %v47_v31 = vld [vmem:[%s165_s1 + $0x10] sm:$0x1f] }
   0x2   :  { %v13_v1 = vsel %vm12_vm0, %v11_v0, -inf  ;;  %v45_v29 = vld [vmem:[%s165_s1] sm:$0x1f]  ;;  %v48_v36 = vld [vmem:[%s165_s1 + $0x18] sm:$0x1f] }
   0x3   :  { %v14_v2 = vrot.slane %v13_v1, 4  ;;  %v49_v44 = vld [vmem:[%s165_s1 + $0x20] sm:$0x1f]  ;;  %v50_v51 = vld [vmem:[%s165_s1 + $0x28] sm:$0x1f] }
   0x4   :  { %v51_v57 = vld [vmem:[%s165_s1 + $0x30] sm:$0x1f]  ;;  %v52_v62 = vld [vmem:[%s165_s1 + $0x38] sm:$0x1f] }
   0x5   :  { %v15_v3 = vmax.f32 %v13_v1, %v14_v2 }
   0x7   :  { %v16_v4 = vrot.slane %v15_v3, 2 }
   0x9   :  { %v17_v5 = vmax.f32 %v15_v3, %v16_v4 }
   0xb   :  { %v18_v6 = vrot.slane %v17_v5, 1 }
   0xd   :  { %v19_v7 = vmax.f32 %v17_v5, %v18_v6 }
   0xf   :  { %v20_v8 = vsub.f32 %v11_v0, %v19_v7 }
  0x11   :  { %v21_v9 = vmul.f32 1.442695, %v20_v8 }
  0x13   :  { %106 = vpow2.f32 %v21_v9 }
  0x19   :  { %v107_v10 = vpop.eup %106 }
  0x1a   :  { %v23_v11 = vsel %vm12_vm0, %v107_v10, 0.0 }
  0x1b   :  { %v24_v12 = vrot.slane %v23_v11, 4 }
  0x1d   :  { %v25_v13 = vadd.f32 %v24_v12, %v23_v11 }
  0x1f   :  { %v26_v14 = vrot.slane %v25_v13, 2 }
  0x21   :  { %v27_v15 = vadd.f32 %v26_v14, %v25_v13 }
  0x23   :  { %v28_v16 = vrot.slane %v27_v15, 1 }
  0x25   :  { %v29_v17 = vadd.f32 %v28_v16, %v27_v15 }
  0x27   :  { %108 = vrcp.f32 %v29_v17  ;;  %v41_v20 = vand.u32 2147483648, %v29_v17  ;;  %vm35_vm1 = vweird.f32 %v29_v17  ;;  %v39_v22 = vand.u32 2147483647, %v29_v17 }
  0x29   :  { %v42_v24 = vor.u32 1.1754944e-38, %v41_v20  ;;  %vm40_vm4 = vcmp.eq.f32.partialorder %v39_v22, 8.507059e+37 }
  0x2d   :  { %v109_v18 = vpop.eup %108 }
  0x2e   :  { %v31_v19 = vmul.f32 %v109_v18, %v29_v17  ;;  %vm36_vm2 = vweird.f32 %v109_v18 }
  0x2f   :  { %vm37_vm3 = vmor %vm35_vm1, %vm36_vm2 }
  0x30   :  { %v32_v21 = vsub.f32 1.0, %v31_v19 }
  0x32   :  { %v33_v23 = vmul.f32 %v109_v18, %v32_v21 }
  0x34   :  { %v34_v25 = vadd.f32 %v109_v18, %v33_v23 }
  0x36   :  { %v38_v26 = vsel %vm37_vm3, %v109_v18, %v34_v25 }
  0x37   :  { %v43_v27 = vsel %vm40_vm4, %v42_v24, %v38_v26 }
  0x38   :  { %v44_v28 = vmul.f32 %v107_v10, %v43_v27 }
  0x3a   :  { %v54_v32 = vrot.slane %v44_v28, 1  ;;  %v55_v33 = vrot.slane %v44_v28, 2  ;;  %v56_v34 = vrot.slane %v44_v28, 3  ;;  %v57_v35 = vrot.slane %v44_v28, 4 }
  0x3b   :  { %v58_v37 = vrot.slane %v44_v28, 5  ;;  %v59_v38 = vrot.slane %v44_v28, 6  ;;  %v61_v39 = vperm.slane %v44_v28, 0  ;;  %v60_v45 = vrot.slane %v44_v28, 7 }
  0x3c   :  { %v62_v40 = vperm.slane %v54_v32, 0  ;;  %v63_v41 = vperm.slane %v55_v33, 0  ;;  %v64_v42 = vperm.slane %v56_v34, 0  ;;  %v65_v43 = vperm.slane %v57_v35, 0 }
  0x3d   :  { %v77_v46 = vmul.f32 %v61_v39, %v45_v29  ;;  %v66_v47 = vperm.slane %v58_v37, 0  ;;  %v67_v53 = vperm.slane %v59_v38, 0  ;;  %v68_v59 = vperm.slane %v60_v45, 0 }
  0x3e   :  { %v78_v48 = vmul.f32 %v62_v40, %v46_v30  ;;  %v79_v49 = vmul.f32 %v63_v41, %v47_v31  ;;  %v80_v50 = vmul.f32 %v64_v42, %v48_v36  ;;  %v81_v54 = vmul.f32 %v65_v43, %v49_v44 }
  0x3f   :  { %v86_v52 = vsel %vm85_vm5, %v77_v46, 0.0  ;;  %v82_v60 = vmul.f32 %v66_v47, %v50_v51  ;;  %v83_v0 = vmul.f32 %v67_v53, %v51_v57  ;;  %v84_v3 = vmul.f32 %v68_v59, %v52_v62 }
  0x40   :  { %v87_v55 = vsel %vm85_vm5, %v78_v48, 0.0  ;;  %v89_v56 = vsel %vm85_vm5, %v79_v49, 0.0  ;;  %v91_v61 = vsel %vm85_vm5, %v80_v50, 0.0  ;;  %v93_v1 = vsel %vm85_vm5, %v81_v54, 0.0 }
  0x41   :  { %v88_v58 = vadd.f32 %v87_v55, %v86_v52  ;;  %v95_v4 = vsel %vm85_vm5, %v82_v60, 0.0  ;;  %v97_v6 = vsel %vm85_vm5, %v83_v0, 0.0  ;;  %v99_v8 = vsel %vm85_vm5, %v84_v3, 0.0 }
  0x43   :  { %v90_v63 = vadd.f32 %v89_v56, %v88_v58 }
  0x45   :  { %v92_v2 = vadd.f32 %v91_v61, %v90_v63 }
  0x47   :  { %v94_v5 = vadd.f32 %v93_v1, %v92_v2 }
  0x49   :  { %v96_v7 = vadd.f32 %v95_v4, %v94_v5 }
  0x4b   :  { %v98_v9 = vadd.f32 %v97_v6, %v96_v7 }
  0x4d   :  { %v100_v10 = vadd.f32 %v99_v8, %v98_v9 }
  0x4f   :  { %101 = vst.msk [vmem:[%s166_s2] sm:$0x1f] %vm85_vm5, %v100_v10 }

</bundles_post_ra>
